<compile_context>
chip_gen: v5e
topology: v5e:2x2
jax: 0.10.0
libtpu: 0.0.40
codegen_flags: <defaults>
</compile_context>

<pallas_src>
import numpy as np
import jax
import jax.numpy as jnp
from jax import lax
from jax.experimental import pallas as pl
from jax.experimental.pallas import tpu as pltpu  # noqa: F401  (defaults already map all operands full-block into VMEM)

# ----------------------------- model config ---------------------------------
EMBED_DIM = 32
NUM_HEADS = 4
HEAD_DIM = EMBED_DIM // NUM_HEADS
FF_DIM = 64
SEQ = 8
BATCH = 2
LN_EPS = 1e-5

TOKENS = BATCH * SEQ              # 16 token rows seen by the kernel
COLS = NUM_HEADS * TOKENS         # 64 expanded key/value columns: c = h*TOKENS + b*SEQ + j
SCALE = 1.0 / float(HEAD_DIM) ** 0.5


def _layernorm(y, gamma, beta):
    # PyTorch nn.LayerNorm: biased variance, eps inside sqrt.
    mu = jnp.mean(y, axis=-1, keepdims=True)
    var = jnp.mean((y - mu) ** 2, axis=-1, keepdims=True)
    return (y - mu) * lax.rsqrt(var + LN_EPS) * gamma + beta


def transformer_block_kernel(
    x_ref,                      # (TOKENS, E)
    wqkv_ref, bqkv_ref,         # (E, 3E), (1, 3E)   fused Q|K|V projection
    wo_ref, bo_ref,             # (E, E), (1, E)
    g1_ref, be1_ref,            # LayerNorm1
    w1_ref, b1_ref,             # (E, FF), (1, FF)
    w2_ref, b2_ref,             # (FF, E), (1, E)
    g2_ref, be2_ref,            # LayerNorm2
    km_ref,                     # (COLS, E)    head-selection mask: 1 iff lane's head == column's head
    seg_ref,                    # (COLS, COLS) 1 iff both columns in the same (head, batch) block of SEQ
    bm_ref,                     # (TOKENS, COLS) 1 iff row's batch == column's batch
    o_ref,                      # (TOKENS, E)
):
    x = x_ref[...]                                                        # (16, 32)

    # ---- fused QKV projection: one wide MXU matmul (96 lanes live) ----
    qkv = jnp.dot(x, wqkv_ref[...], preferred_element_type=jnp.float32) + bqkv_ref[...]
    q = qkv[:, :EMBED_DIM]                                                # (16, 32)
    k = qkv[:, EMBED_DIM:2 * EMBED_DIM]
    v = qkv[:, 2 * EMBED_DIM:]

    # ---- build head-major masked key/value slabs (sublane replication only) ----
    km = km_ref[...]                                                      # (64, 32)
    k_sel = jnp.concatenate([k] * NUM_HEADS, axis=0) * km                 # (64, 32)
    v_sel = jnp.concatenate([v] * NUM_HEADS, axis=0) * km                 # (64, 32)

    # ---- all heads x all batches scores in ONE matmul ----
    # scores[r, c] = <q_row_r (head-h lanes), k_row_t (head-h lanes)>,  c = h*16 + t
    scores = lax.dot_general(q, k_sel, (((1,), (1,)), ((), ())),
                             preferred_element_type=jnp.float32) * SCALE  # (16, 64)

    # ---- segmented softmax (per 8-column (head,batch) block) ----
    m = jnp.max(scores, axis=-1, keepdims=True)        # global row max: valid shift for every segment
    e = jnp.exp(scores - m)                            # (16, 64), all positive -> segment sums never 0
    seg_sum = jnp.dot(e, seg_ref[...], preferred_element_type=jnp.float32)  # broadcast per-segment sums
    p = e * pl.reciprocal(seg_sum, approx=True) * bm_ref[...]   # zero cross-batch weights (no NaN path)

    # ---- context: heads land directly in their own output lanes ----
    ctx = jnp.dot(p, v_sel, preferred_element_type=jnp.float32)           # (16, 32)
    attn_out = jnp.dot(ctx, wo_ref[...], preferred_element_type=jnp.float32) + bo_ref[...]

    # ---- residual + LayerNorm1 ----
    x1 = _layernorm(x + attn_out, g1_ref[...], be1_ref[...])

    # ---- FFN: Linear -> ReLU -> Linear ----
    h1 = jnp.dot(x1, w1_ref[...], preferred_element_type=jnp.float32) + b1_ref[...]
    h1 = jnp.maximum(h1, 0.0)
    ffn = jnp.dot(h1, w2_ref[...], preferred_element_type=jnp.float32) + b2_ref[...]

    # ---- residual + LayerNorm2 ----
    o_ref[...] = _layernorm(x1 + ffn, g2_ref[...], be2_ref[...]).astype(o_ref.dtype)


def _attention_masks():
    """Constant 0/1 masks describing the head/batch block structure (built once, host-side)."""
    c = np.arange(COLS)
    c_head = c // TOKENS                   # head index of expanded column
    c_tok = c % TOKENS                     # original token row (b*SEQ + j)
    c_batch = c_tok // SEQ
    e_head = np.arange(EMBED_DIM) // HEAD_DIM
    km = (c_head[:, None] == e_head[None, :]).astype(np.float32)            # (COLS, E)
    seg = ((c[:, None] // SEQ) == (c[None, :] // SEQ)).astype(np.float32)   # (COLS, COLS)
    r_batch = np.arange(TOKENS) // SEQ
    bm = (r_batch[:, None] == c_batch[None, :]).astype(np.float32)          # (TOKENS, COLS)
    return jnp.asarray(km), jnp.asarray(seg), jnp.asarray(bm)


def transformer_block(x, params):
    (wq, bq, wk, bk, wv, bv, wo, bo, g1, be1, w1, b1, w2, b2, g2, be2) = params
    B, S, E = x.shape

    # Fuse Q/K/V into a single (E, 3E) weight so the kernel does one projection matmul.
    wqkv = jnp.concatenate([wq, wk, wv], axis=1)     # (E, 3E)
    bqkv = jnp.concatenate([bq, bk, bv], axis=1)     # (1, 3E)
    km, seg, bm = _attention_masks()

    x2d = x.reshape(B * S, E)

    # Single invocation: no grid, every operand is a full block resident in VMEM
    # (total parameters + activations << VMEM on v5e/v6e/v7x), so there is no
    # per-step DMA or pipeline overhead at all.
    out2d = pl.pallas_call(
        transformer_block_kernel,
        out_shape=jax.ShapeDtypeStruct((B * S, E), x.dtype),
    )(x2d, wqkv, bqkv, wo, bo, g1, be1, w1, b1, w2, b2, g2, be2, km, seg, bm)

    return out2d.reshape(B, S, E)


# --------------------------- pure-JAX reference ------------------------------
def transformer_block_ref(x, params):
    (wq, bq, wk, bk, wv, bv, wo, bo, g1, be1, w1, b1, w2, b2, g2, be2) = params
    B, S, E = x.shape
    q = x @ wq + bq
    k = x @ wk + bk
    v = x @ wv + bv
    qh = q.reshape(B, S, NUM_HEADS, HEAD_DIM).transpose(0, 2, 1, 3)
    kh = k.reshape(B, S, NUM_HEADS, HEAD_DIM).transpose(0, 2, 1, 3)
    vh = v.reshape(B, S, NUM_HEADS, HEAD_DIM).transpose(0, 2, 1, 3)
    scores = jnp.einsum("bhqd,bhkd->bhqk", qh, kh) / (HEAD_DIM ** 0.5)
    p = jax.nn.softmax(scores, axis=-1)
    attn = jnp.einsum("bhqk,bhkd->bhqd", p, vh).transpose(0, 2, 1, 3).reshape(B, S, E)
    attn_out = attn @ wo + bo

    def ln(y, g, b):
        mu = jnp.mean(y, axis=-1, keepdims=True)
        var = jnp.mean((y - mu) ** 2, axis=-1, keepdims=True)
        return (y - mu) / jnp.sqrt(var + LN_EPS) * g + b

    x1 = ln(x + attn_out, g1, be1)
    ffn = jnp.maximum(x1 @ w1 + b1, 0.0) @ w2 + b2
    return ln(x1 + ffn, g2, be2)


# --------------------------------- main --------------------------------------
if __name__ == "__main__":
    key = jax.random.PRNGKey(0)
    keys = jax.random.split(key, 12)

    def init(k, shape, scale=0.02):
        return (scale * jax.random.normal(k, shape)).astype(jnp.float32)

    # weights stored as (in, out); biases / LN params as (1, dim) for 2D refs
    wq = init(keys[0], (EMBED_DIM, EMBED_DIM)); bq = init(keys[1], (1, EMBED_DIM))
    wk = init(keys[2], (EMBED_DIM, EMBED_DIM)); bk = init(keys[3], (1, EMBED_DIM))
    wv = init(keys[4], (EMBED_DIM, EMBED_DIM)); bv = init(keys[5], (1, EMBED_DIM))
    wo = init(keys[6], (EMBED_DIM, EMBED_DIM)); bo = init(keys[7], (1, EMBED_DIM))
    g1 = jnp.ones((1, EMBED_DIM), jnp.float32); be1 = jnp.zeros((1, EMBED_DIM), jnp.float32)
    w1 = init(keys[8], (EMBED_DIM, FF_DIM));    b1 = init(keys[9], (1, FF_DIM))
    w2 = init(keys[10], (FF_DIM, EMBED_DIM));   b2 = init(keys[11], (1, EMBED_DIM))
    g2 = jnp.ones((1, EMBED_DIM), jnp.float32); be2 = jnp.zeros((1, EMBED_DIM), jnp.float32)

    params = (wq, bq, wk, bk, wv, bv, wo, bo, g1, be1, w1, b1, w2, b2, g2, be2)

    x = jax.random.normal(jax.random.PRNGKey(42), (BATCH, SEQ, EMBED_DIM),
                          dtype=jnp.float32)

    out = transformer_block(x, params)
    out = jax.block_until_ready(out)

    ref = transformer_block_ref(x, params)
    assert out.shape == (BATCH, SEQ, EMBED_DIM)
    # tolerance slightly above 1e-4: the EUP approximate reciprocal in the softmax
    # denominator introduces ~1e-4 relative error on p, which is heavily attenuated
    # by the output projection and LayerNorms before reaching the output.
    assert jnp.allclose(out, ref, atol=2e-4, rtol=2e-4), "mismatch vs reference"

    print("KERNEL_OK")
</pallas_src>

<mosaic_0001>
module attributes {stable_mosaic.version = 11 : i64} {
  func.func @transformer_block_kernel(%arg0: memref<16x32xf32, #tpu.memory_space<vmem>>, %arg1: memref<32x96xf32, #tpu.memory_space<vmem>>, %arg2: memref<1x96xf32, #tpu.memory_space<vmem>>, %arg3: memref<32x32xf32, #tpu.memory_space<vmem>>, %arg4: memref<1x32xf32, #tpu.memory_space<vmem>>, %arg5: memref<1x32xf32, #tpu.memory_space<vmem>>, %arg6: memref<1x32xf32, #tpu.memory_space<vmem>>, %arg7: memref<32x64xf32, #tpu.memory_space<vmem>>, %arg8: memref<1x64xf32, #tpu.memory_space<vmem>>, %arg9: memref<64x32xf32, #tpu.memory_space<vmem>>, %arg10: memref<1x32xf32, #tpu.memory_space<vmem>>, %arg11: memref<1x32xf32, #tpu.memory_space<vmem>>, %arg12: memref<1x32xf32, #tpu.memory_space<vmem>>, %arg13: memref<64x32xf32, #tpu.memory_space<vmem>>, %arg14: memref<64x64xf32, #tpu.memory_space<vmem>>, %arg15: memref<16x64xf32, #tpu.memory_space<vmem>>, %arg16: memref<16x32xf32, #tpu.memory_space<vmem>>) attributes {dimension_semantics = [], scalar_prefetch = 0 : i64, scratch_operands = 0 : i64, tpu.core_type = #tpu.core_type<tc>} {
    %c0 = arith.constant 0 : index
    %c0_0 = arith.constant 0 : index
    %0 = vector.load %arg0[%c0, %c0_0] : memref<16x32xf32, #tpu.memory_space<vmem>>, vector<16x32xf32>
    %c0_1 = arith.constant 0 : index
    %c0_2 = arith.constant 0 : index
    %1 = vector.load %arg1[%c0_1, %c0_2] : memref<32x96xf32, #tpu.memory_space<vmem>>, vector<32x96xf32>
    %cst = arith.constant dense<0.000000e+00> : vector<16x96xf32>
    %2 = tpu.matmul %0, %1, %cst {dimension_numbers = #tpu.dot_dimension_numbers<[1], [0], [0], [1], [0, 0, 1, 1], [], []>} : vector<16x32xf32>, vector<32x96xf32>, vector<16x96xf32> -> vector<16x96xf32>
    %c0_3 = arith.constant 0 : index
    %c0_4 = arith.constant 0 : index
    %3 = vector.load %arg2[%c0_3, %c0_4] : memref<1x96xf32, #tpu.memory_space<vmem>>, vector<1x96xf32>
    %4 = vector.broadcast %3 : vector<1x96xf32> to vector<16x96xf32>
    %5 = arith.addf %2, %4 : vector<16x96xf32>
    %6 = vector.extract_strided_slice %5 {offsets = [0, 0], sizes = [16, 32], strides = [1, 1]} : vector<16x96xf32> to vector<16x32xf32>
    %7 = vector.extract_strided_slice %5 {offsets = [0, 32], sizes = [16, 32], strides = [1, 1]} : vector<16x96xf32> to vector<16x32xf32>
    %8 = vector.extract_strided_slice %5 {offsets = [0, 64], sizes = [16, 32], strides = [1, 1]} : vector<16x96xf32> to vector<16x32xf32>
    %c0_5 = arith.constant 0 : index
    %c0_6 = arith.constant 0 : index
    %9 = vector.load %arg13[%c0_5, %c0_6] : memref<64x32xf32, #tpu.memory_space<vmem>>, vector<64x32xf32>
    %10 = tpu.concatenate %7, %7, %7, %7 in 0 : vector<16x32xf32>, vector<16x32xf32>, vector<16x32xf32>, vector<16x32xf32> -> vector<64x32xf32>
    %11 = arith.mulf %10, %9 : vector<64x32xf32>
    %12 = tpu.concatenate %8, %8, %8, %8 in 0 : vector<16x32xf32>, vector<16x32xf32>, vector<16x32xf32>, vector<16x32xf32> -> vector<64x32xf32>
    %13 = arith.mulf %12, %9 : vector<64x32xf32>
    %cst_7 = arith.constant dense<0.000000e+00> : vector<16x64xf32>
    %14 = tpu.matmul %6, %11, %cst_7 {dimension_numbers = #tpu.dot_dimension_numbers<[1], [1], [0], [0], [0, 0, 1, 0], [], []>} : vector<16x32xf32>, vector<64x32xf32>, vector<16x64xf32> -> vector<16x64xf32>
    %cst_8 = arith.constant 0.353553385 : f32
    %15 = vector.broadcast %cst_8 : f32 to vector<16x64xf32>
    %16 = arith.mulf %14, %15 : vector<16x64xf32>
    %cst_9 = arith.constant dense<0xFF800000> : vector<16xf32>
    %17 = vector.multi_reduction <maximumf>, %16, %cst_9 [1] : vector<16x64xf32> to vector<16xf32>
    %18 = vector.shape_cast %17 : vector<16xf32> to vector<16x1xf32>
    %19 = vector.broadcast %18 : vector<16x1xf32> to vector<16x64xf32>
    %20 = arith.subf %16, %19 : vector<16x64xf32>
    %21 = math.exp %20 : vector<16x64xf32>
    %c0_10 = arith.constant 0 : index
    %c0_11 = arith.constant 0 : index
    %22 = vector.load %arg14[%c0_10, %c0_11] : memref<64x64xf32, #tpu.memory_space<vmem>>, vector<64x64xf32>
    %cst_12 = arith.constant dense<0.000000e+00> : vector<16x64xf32>
    %23 = tpu.matmul %21, %22, %cst_12 {dimension_numbers = #tpu.dot_dimension_numbers<[1], [0], [0], [1], [0, 0, 1, 1], [], []>} : vector<16x64xf32>, vector<64x64xf32>, vector<16x64xf32> -> vector<16x64xf32>
    %24 = tpu.reciprocal %23 {approx = true} : vector<16x64xf32> -> vector<16x64xf32>
    %25 = arith.mulf %21, %24 : vector<16x64xf32>
    %c0_13 = arith.constant 0 : index
    %c0_14 = arith.constant 0 : index
    %26 = vector.load %arg15[%c0_13, %c0_14] : memref<16x64xf32, #tpu.memory_space<vmem>>, vector<16x64xf32>
    %27 = arith.mulf %25, %26 : vector<16x64xf32>
    %cst_15 = arith.constant dense<0.000000e+00> : vector<16x32xf32>
    %28 = tpu.matmul %27, %13, %cst_15 {dimension_numbers = #tpu.dot_dimension_numbers<[1], [0], [0], [1], [0, 0, 1, 1], [], []>} : vector<16x64xf32>, vector<64x32xf32>, vector<16x32xf32> -> vector<16x32xf32>
    %c0_16 = arith.constant 0 : index
    %c0_17 = arith.constant 0 : index
    %29 = vector.load %arg3[%c0_16, %c0_17] : memref<32x32xf32, #tpu.memory_space<vmem>>, vector<32x32xf32>
    %cst_18 = arith.constant dense<0.000000e+00> : vector<16x32xf32>
    %30 = tpu.matmul %28, %29, %cst_18 {dimension_numbers = #tpu.dot_dimension_numbers<[1], [0], [0], [1], [0, 0, 1, 1], [], []>} : vector<16x32xf32>, vector<32x32xf32>, vector<16x32xf32> -> vector<16x32xf32>
    %c0_19 = arith.constant 0 : index
    %c0_20 = arith.constant 0 : index
    %31 = vector.load %arg4[%c0_19, %c0_20] : memref<1x32xf32, #tpu.memory_space<vmem>>, vector<1x32xf32>
    %32 = vector.broadcast %31 : vector<1x32xf32> to vector<16x32xf32>
    %33 = arith.addf %30, %32 : vector<16x32xf32>
    %34 = arith.addf %0, %33 : vector<16x32xf32>
    %c0_21 = arith.constant 0 : index
    %c0_22 = arith.constant 0 : index
    %35 = vector.load %arg5[%c0_21, %c0_22] : memref<1x32xf32, #tpu.memory_space<vmem>>, vector<1x32xf32>
    %c0_23 = arith.constant 0 : index
    %c0_24 = arith.constant 0 : index
    %36 = vector.load %arg6[%c0_23, %c0_24] : memref<1x32xf32, #tpu.memory_space<vmem>>, vector<1x32xf32>
    %cst_25 = arith.constant dense<0.000000e+00> : vector<16xf32>
    %37 = vector.multi_reduction <add>, %34, %cst_25 [1] : vector<16x32xf32> to vector<16xf32>
    %38 = vector.shape_cast %37 : vector<16xf32> to vector<16x1xf32>
    %cst_26 = arith.constant 3.200000e+01 : f32
    %39 = vector.broadcast %cst_26 : f32 to vector<16x1xf32>
    %40 = arith.divf %38, %39 : vector<16x1xf32>
    %41 = vector.broadcast %40 : vector<16x1xf32> to vector<16x32xf32>
    %42 = arith.subf %34, %41 : vector<16x32xf32>
    %43 = arith.mulf %42, %42 : vector<16x32xf32>
    %cst_27 = arith.constant dense<0.000000e+00> : vector<16xf32>
    %44 = vector.multi_reduction <add>, %43, %cst_27 [1] : vector<16x32xf32> to vector<16xf32>
    %45 = vector.shape_cast %44 : vector<16xf32> to vector<16x1xf32>
    %cst_28 = arith.constant 3.200000e+01 : f32
    %46 = vector.broadcast %cst_28 : f32 to vector<16x1xf32>
    %47 = arith.divf %45, %46 : vector<16x1xf32>
    %48 = vector.broadcast %40 : vector<16x1xf32> to vector<16x32xf32>
    %49 = arith.subf %34, %48 : vector<16x32xf32>
    %cst_29 = arith.constant 9.99999974E-6 : f32
    %50 = vector.broadcast %cst_29 : f32 to vector<16x1xf32>
    %51 = arith.addf %47, %50 : vector<16x1xf32>
    %52 = math.rsqrt %51 : vector<16x1xf32>
    %53 = vector.broadcast %52 : vector<16x1xf32> to vector<16x32xf32>
    %54 = arith.mulf %49, %53 : vector<16x32xf32>
    %55 = vector.broadcast %35 : vector<1x32xf32> to vector<16x32xf32>
    %56 = arith.mulf %54, %55 : vector<16x32xf32>
    %57 = vector.broadcast %36 : vector<1x32xf32> to vector<16x32xf32>
    %58 = arith.addf %56, %57 : vector<16x32xf32>
    %c0_30 = arith.constant 0 : index
    %c0_31 = arith.constant 0 : index
    %59 = vector.load %arg7[%c0_30, %c0_31] : memref<32x64xf32, #tpu.memory_space<vmem>>, vector<32x64xf32>
    %cst_32 = arith.constant dense<0.000000e+00> : vector<16x64xf32>
    %60 = tpu.matmul %58, %59, %cst_32 {dimension_numbers = #tpu.dot_dimension_numbers<[1], [0], [0], [1], [0, 0, 1, 1], [], []>} : vector<16x32xf32>, vector<32x64xf32>, vector<16x64xf32> -> vector<16x64xf32>
    %c0_33 = arith.constant 0 : index
    %c0_34 = arith.constant 0 : index
    %61 = vector.load %arg8[%c0_33, %c0_34] : memref<1x64xf32, #tpu.memory_space<vmem>>, vector<1x64xf32>
    %62 = vector.broadcast %61 : vector<1x64xf32> to vector<16x64xf32>
    %63 = arith.addf %60, %62 : vector<16x64xf32>
    %cst_35 = arith.constant 0.000000e+00 : f32
    %64 = vector.broadcast %cst_35 : f32 to vector<16x64xf32>
    %65 = arith.maximumf %63, %64 : vector<16x64xf32>
    %c0_36 = arith.constant 0 : index
    %c0_37 = arith.constant 0 : index
    %66 = vector.load %arg9[%c0_36, %c0_37] : memref<64x32xf32, #tpu.memory_space<vmem>>, vector<64x32xf32>
    %cst_38 = arith.constant dense<0.000000e+00> : vector<16x32xf32>
    %67 = tpu.matmul %65, %66, %cst_38 {dimension_numbers = #tpu.dot_dimension_numbers<[1], [0], [0], [1], [0, 0, 1, 1], [], []>} : vector<16x64xf32>, vector<64x32xf32>, vector<16x32xf32> -> vector<16x32xf32>
    %c0_39 = arith.constant 0 : index
    %c0_40 = arith.constant 0 : index
    %68 = vector.load %arg10[%c0_39, %c0_40] : memref<1x32xf32, #tpu.memory_space<vmem>>, vector<1x32xf32>
    %69 = vector.broadcast %68 : vector<1x32xf32> to vector<16x32xf32>
    %70 = arith.addf %67, %69 : vector<16x32xf32>
    %71 = arith.addf %58, %70 : vector<16x32xf32>
    %c0_41 = arith.constant 0 : index
    %c0_42 = arith.constant 0 : index
    %72 = vector.load %arg11[%c0_41, %c0_42] : memref<1x32xf32, #tpu.memory_space<vmem>>, vector<1x32xf32>
    %c0_43 = arith.constant 0 : index
    %c0_44 = arith.constant 0 : index
    %73 = vector.load %arg12[%c0_43, %c0_44] : memref<1x32xf32, #tpu.memory_space<vmem>>, vector<1x32xf32>
    %cst_45 = arith.constant dense<0.000000e+00> : vector<16xf32>
    %74 = vector.multi_reduction <add>, %71, %cst_45 [1] : vector<16x32xf32> to vector<16xf32>
    %75 = vector.shape_cast %74 : vector<16xf32> to vector<16x1xf32>
    %cst_46 = arith.constant 3.200000e+01 : f32
    %76 = vector.broadcast %cst_46 : f32 to vector<16x1xf32>
    %77 = arith.divf %75, %76 : vector<16x1xf32>
    %78 = vector.broadcast %77 : vector<16x1xf32> to vector<16x32xf32>
    %79 = arith.subf %71, %78 : vector<16x32xf32>
    %80 = arith.mulf %79, %79 : vector<16x32xf32>
    %cst_47 = arith.constant dense<0.000000e+00> : vector<16xf32>
    %81 = vector.multi_reduction <add>, %80, %cst_47 [1] : vector<16x32xf32> to vector<16xf32>
    %82 = vector.shape_cast %81 : vector<16xf32> to vector<16x1xf32>
    %cst_48 = arith.constant 3.200000e+01 : f32
    %83 = vector.broadcast %cst_48 : f32 to vector<16x1xf32>
    %84 = arith.divf %82, %83 : vector<16x1xf32>
    %85 = vector.broadcast %77 : vector<16x1xf32> to vector<16x32xf32>
    %86 = arith.subf %71, %85 : vector<16x32xf32>
    %cst_49 = arith.constant 9.99999974E-6 : f32
    %87 = vector.broadcast %cst_49 : f32 to vector<16x1xf32>
    %88 = arith.addf %84, %87 : vector<16x1xf32>
    %89 = math.rsqrt %88 : vector<16x1xf32>
    %90 = vector.broadcast %89 : vector<16x1xf32> to vector<16x32xf32>
    %91 = arith.mulf %86, %90 : vector<16x32xf32>
    %92 = vector.broadcast %72 : vector<1x32xf32> to vector<16x32xf32>
    %93 = arith.mulf %91, %92 : vector<16x32xf32>
    %94 = vector.broadcast %73 : vector<1x32xf32> to vector<16x32xf32>
    %95 = arith.addf %93, %94 : vector<16x32xf32>
    %c0_50 = arith.constant 0 : index
    %c0_51 = arith.constant 0 : index
    %96 = vector.load %arg16[%c0_50, %c0_51] : memref<16x32xf32, #tpu.memory_space<vmem>>, vector<16x32xf32>
    tpu.vector_store %arg16[%c0_50, %c0_51], %95 {strides = array<i32>} : memref<16x32xf32, #tpu.memory_space<vmem>>, vector<16x32xf32>,
    return
  }
}

</mosaic_0001>

<bundles_post_ra>
// kernel: tpu_custom_call.1
= control target key start
LH: loop header
LB: loop body
LE: loop exit
PB: predicated region body
PF: predicated region fallthrough
CT: control target
= control target key end

     0   :  { %s1190_s0 = inlined_call_operand.hbm [shape: f32[16,32], index: 0, kind: input, shape index: {}]   ;;  %s1191_s1 = inlined_call_operand.vmem [shape: f32[32,96], index: 1, kind: input, shape index: {}]   ;;  %s1192_s2 = inlined_call_operand.hbm [shape: f32[1,96], index: 2, kind: input, shape index: {}]   ;;  %s1193_s3 = inlined_call_operand.vmem [shape: f32[32,32], index: 3, kind: input, shape index: {}]   ;;  %s1194_s4 = inlined_call_operand.vmem [shape: f32[1,32], index: 4, kind: input, shape index: {}]   ;;  %s1195_s5 = inlined_call_operand.vmem [shape: f32[1,32], index: 5, kind: input, shape index: {}]   ;;  %s1196_s6 = inlined_call_operand.vmem [shape: f32[1,32], index: 6, kind: input, shape index: {}]   ;;  %s1197_s7 = inlined_call_operand.vmem [shape: f32[32,64], index: 7, kind: input, shape index: {}]   ;;  %s1198_s8 = inlined_call_operand.vmem [shape: f32[1,64], index: 8, kind: input, shape index: {}]   ;;  %s1199_s9 = inlined_call_operand.vmem [shape: f32[64,32], index: 9, kind: input, shape index: {}]   ;;  %s1200_s10 = inlined_call_operand.vmem [shape: f32[1,32], index: 10, kind: input, shape index: {}]   ;;  %s1201_s11 = inlined_call_operand.vmem [shape: f32[1,32], index: 11, kind: input, shape index: {}]   ;;  %s1202_s12 = inlined_call_operand.vmem [shape: f32[1,32], index: 12, kind: input, shape index: {}]   ;;  %s1203_s13 = inlined_call_operand.vmem [shape: f32[64,32], index: 13, kind: input, shape index: {}]   ;;  %s1204_s14 = inlined_call_operand.vmem [shape: f32[64,64], index: 14, kind: input, shape index: {}]   ;;  %s1205_s15 = inlined_call_operand.hbm [shape: f32[16,64], index: 15, kind: input, shape index: {}]   ;;  %s1206_s16 = inlined_call_operand.hbm [shape: f32[16,32], index: 16, kind: output, shape index: {}]  }
   0x1   :  { %1207 = sst [smem:[#allocation12_spill]] %s1190_s0 }
   0x2   :  { %21 = vsyncpa [#allocation3], 0 }
   0x3   :  { %22 = vsyncpa [#allocation6], 0  ;;  %s44_s23 = sshll.u32 %s1192_s2, 4  ;;  %s45_s23 = int_to_ptr.hbm [resolvable:$true] %s44_s23 }
   0x4   :  { %23 = vsyncpa [#allocation4], 0  ;;  %s851_s24 = smov [#allocation5]   ;;  %s1208_s28 = sld [smem:[#allocation12_spill]] }
   0x5   :  { %s46_s25 = sshll.u32 %s851_s24, 4  ;;  %s852_s30 = smov [#allocation2]   ;;  %s47_s25 = int_to_ptr.vmem [resolvable:$true] %s46_s25 }
   0x6   :  { %49 = dma.hbm_to_vmem [thread:$0]  %s45_s23, 16, %s47_s25, [#allocation6]  }
   0x7   :  { %s30_s0 = sshll.u32 %s852_s30, 4  ;;  %s853_s17 = smov 128   ;;  %s31_s0 = int_to_ptr.vmem [resolvable:$true] %s30_s0 }
   0x8   :  { %s854_s18 = smov 8   ;;  %s78_s20 = sshll.u32 %s1205_s15, 4  ;;  %s79_s20 = int_to_ptr.hbm [resolvable:$true] %s78_s20 }
   0x9   :  { %s855_s21 = smov [#allocation7]  }
   0xa   :  { %s28_s29 = sshll.u32 %s1208_s28, 4  ;;  %s80_s22 = sshll.u32 %s855_s21, 4  ;;  %s29_s29 = int_to_ptr.hbm [resolvable:$true] %s28_s29  ;;  %s81_s22 = int_to_ptr.vmem [resolvable:$true] %s80_s22 }
   0xb   :  { %36 = dma.hbm_to_vmem [thread:$0]  %s29_s29, 256, %s31_s0, [#allocation3], %s853_s17, %s853_s17, %s854_s18  }
   0xc   :  { %86 = dma.hbm_to_vmem [thread:$0]  %s79_s20, 256, %s81_s22, [#allocation6], %s853_s17, %s853_s17, %s854_s18  }
   0xd   :  { %845 = dma.done.wait [#allocation3], 256  }
   0xe   :  { %846 = vsyncadd [#allocation3], 4294967040 }
   0xf   :  { %847 = dma.done.wait [#allocation6], 272  }
  0x10   :  { %848 = vsyncadd [#allocation6], 4294967024  ;;  %v104_v0 = vld [vmem:[%s1191_s1 + $0x18] sm:$0xff]  ;;  %v103_v1 = vld [vmem:[%s1191_s1 + $0x10] sm:$0xff]  ;;  %s856_s28 = smov 32   ;;  %vm109_vm0 = vcmask 261120  }
  0x11   :  { %v144_v2 = vld [vmem:[%s1203_s13 + $0x28] sm:$0xff]  ;;  %128 = vmatpush.msra.mxu0 %v104_v0  ;;  %v146_v4 = vld [vmem:[%s1203_s13 + $0x38] sm:$0xff]  ;;  %v101_v5 = vld [vmem:[%s1191_s1] sm:$0xff]  ;;  %s857_s2 = smov 96   ;;  %vm290_vm1 = vcmask 523264   ;;  %s657_s20 = sshll.u32 %s1206_s16, 4  ;;  %s658_s20 = int_to_ptr.hbm [resolvable:$true] %s657_s20 }
  0x12   :  { %165 = vrot.lane.b32.xlu1 %v144_v2, %s856_s28  ;;  %v102_v3 = vld [vmem:[%s1191_s1 + $0x8] sm:$0xff]  ;;  %v979_v6 = vld [vmem:[#allocation2] sm:$0xff]  ;;  %169 = vrot.lane.b32.xlu0 %v146_v4, %s856_s28  ;;  %v142_v8 = vld [vmem:[%s1203_s13 + $0x18] sm:$0xff] }
  0x13   :  { %129 = vmatpush.msra.mxu0 %v103_v1  ;;  %v143_v7 = vld [vmem:[%s1203_s13 + $0x20] sm:$0xff]  ;;  %161 = vrot.lane.b32.xlu2 %v142_v8, %s856_s28  ;;  %v145_v9 = vld [vmem:[%s1203_s13 + $0x30] sm:$0xff]  ;;  %v997_v11 = vld [vmem:[#allocation2 + $0x8] sm:$0xff] }
  0x14   :  { %v995_v10 = vld [vmem:[%s1203_s13 + $0x10] sm:$0xff]  ;;  %v139_v12 = vld [vmem:[%s1203_s13] sm:$0xff]  ;;  %v1008_v13 = vld [vmem:[%s1203_s13 + $0x8] sm:$0xff]  ;;  %s858_s13 = smov 64  }
  0x15   :  { %130 = vmatpush.msra.mxu0 %v102_v3  ;;  %v723_v16 = vld [vmem:[#allocation5] ss:$0 sm:$0xff]  ;;  %v310_v61 = vld [vmem:[%s1204_s14 + $0x38] sm:$0xff] }
  0x16   :  { %v309_v62 = vld [vmem:[%s1204_s14 + $0x30] sm:$0xff]  ;;  %325 = vmatpush.msra.mxu2 %v310_v61 }
  0x17   :  { %131 = vmatpush.msra.mxu0 %v101_v5  ;;  %v308_v5 = vld [vmem:[%s1204_s14 + $0x28] sm:$0xff] }
  0x18   :  { %671 = vmatmul.msk.f32.vlgmr.msra.gmra.mxu0 %vm109_vm0, %v979_v6  ;;  %326 = vmatpush.msra.mxu2 %v309_v62 }
  0x1a   :  { %163 = vrot.lane.b32.xlu1 %v143_v7, %s856_s28  ;;  %167 = vrot.lane.b32.xlu0 %v145_v9, %s856_s28 }
  0x1b   :  { %159 = vrot.lane.b32.xlu2 %v995_v10, %s856_s28  ;;  %327 = vmatpush.msra.mxu2 %v308_v5 }
  0x20   :  { %672 = vmatmul.msk.f32.gmra.mxu0 %vm109_vm0, %v997_v11 }
  0x22   :  { %155 = vrot.lane.b32.xlu1 %v139_v12, %s856_s28  ;;  %157 = vrot.lane.b32.xlu0 %v1008_v13, %s856_s28 }
  0x6d   :  { %v162_v21 = vpop.permute.xlu2 %161 }
  0x75   :  { %v160_v28 = vpop.permute.xlu2 %159 }
  0x84   :  { %v170_v14 = vpop.permute.xlu0 %169  ;;  %v166_v15 = vpop.permute.xlu1 %165 }
  0x8c   :  { %v168_v18 = vpop.permute.xlu0 %167  ;;  %v164_v22 = vpop.permute.xlu1 %163 }
  0x94   :  { %v156_v29 = vpop.permute.xlu1 %155  ;;  %v158_v33 = vpop.permute.xlu0 %157 }
  0x95   :  { %v133_v17 = vpop.f32.mrf.mxu0 }
  0x96   :  { %v1011_v19 = vadd.f32 %v723_v16, %v133_v17 }
  0x98   :  { %v185_v20 = vmul.f32 %v168_v18, %v1011_v19  ;;  %v181_v30 = vmul.f32 %v160_v28, %v1011_v19  ;;  %v183_v31 = vmul.f32 %v164_v22, %v1011_v19  ;;  %v179_v32 = vmul.f32 %v156_v29, %v1011_v19 }
  0x9a   :  { %239 = vrot.lane.b32.xlu0 %v185_v20, %s857_s2 }
  0x9d   :  { %v136_v23 = vpop.f32.mrf.mxu0 }
  0x9e   :  { %v1014_v24 = vadd.f32 %v723_v16, %v136_v23 }
  0xa0   :  { %v186_v25 = vmul.f32 %v170_v14, %v1014_v24  ;;  %v184_v26 = vmul.f32 %v166_v15, %v1014_v24  ;;  %v182_v27 = vmul.f32 %v162_v21, %v1014_v24  ;;  %v180_v34 = vmul.f32 %v158_v33, %v1014_v24 }
  0xa2   :  { %241 = vrot.lane.b32.xlu2 %v186_v25, %s857_s2  ;;  %237 = vrot.lane.b32.xlu1 %v184_v26, %s857_s2 }
  0xa3   :  { %233 = vrot.lane.b32.xlu0 %v182_v27, %s857_s2 }
  0xaa   :  { %235 = vrot.lane.b32.xlu2 %v183_v31, %s857_s2  ;;  %231 = vrot.lane.b32.xlu1 %v181_v30, %s857_s2 }
  0xab   :  { %227 = vrot.lane.b32.xlu0 %v179_v32, %s857_s2 }
  0xb2   :  { %229 = vrot.lane.b32.xlu2 %v180_v34, %s857_s2  ;;  %v412_v34 = vld [vmem:[%s1193_s3 + $0x18] sm:$0xff] }
  0xb3   :  { %201 = vrot.lane.b32.xlu0 %v146_v4, %s858_s13  ;;  %435 = vmatpush.msrb.mxu0 %v412_v34 }
  0xbb   :  { %199 = vrot.lane.b32.xlu0 %v145_v9, %s858_s13  ;;  %v305_v9 = vld [vmem:[%s1204_s14 + $0x10] sm:$0xff] }
  0xc3   :  { %197 = vrot.lane.b32.xlu0 %v144_v2, %s858_s13 }
  0xcb   :  { %195 = vrot.lane.b32.xlu0 %v143_v7, %s858_s13  ;;  %v307_v7 = vld [vmem:[%s1204_s14 + $0x20] sm:$0xff] }
  0xcc   :  { %328 = vmatpush.msra.mxu2 %v307_v7 }
  0xd3   :  { %193 = vrot.lane.b32.xlu0 %v142_v8, %s858_s13  ;;  %v306_v8 = vld [vmem:[%s1204_s14 + $0x18] sm:$0xff] }
  0xd4   :  { %329 = vmatpush.msra.mxu2 %v306_v8 }
  0xd6   :  { %330 = vmatpush.msra.mxu2 %v305_v9 }
  0xdb   :  { %187 = vrot.lane.b32.xlu0 %v139_v12, %s858_s13  ;;  %v303_v12 = vld [vmem:[%s1204_s14] sm:$0xff] }
  0xfc   :  { %v242_v35 = vpop.permute.xlu2 %241 }
  0xfd   :  { %673 = vmatpush.xpose.msk.msra.mxu1 %vm109_vm0, %v242_v35  ;;  %v411_v35 = vld [vmem:[%s1193_s3 + $0x10] sm:$0xff] }
  0xfe   :  { %436 = vmatpush.msrb.mxu0 %v411_v35 }
 0x104   :  { %v236_v39 = vpop.permute.xlu2 %235 }
 0x10c   :  { %v240_v36 = vpop.permute.xlu0 %239  ;;  %v230_v42 = vpop.permute.xlu2 %229 }
 0x10d   :  { %674 = vmatpush.xpose.msk.msra.mxu1 %vm109_vm0, %v240_v36 }
 0x114   :  { %v238_v37 = vpop.permute.xlu1 %237 }
 0x115   :  { %v234_v38 = vpop.permute.xlu0 %233  ;;  %675 = vmatpush.xpose.msk.msra.mxu1 %vm109_vm0, %v238_v37 }
 0x119   :  { %676 = vmatpush.xpose.msk.msra.mxu1 %vm109_vm0, %v236_v39 }
 0x11c   :  { %v232_v41 = vpop.permute.xlu1 %231 }
 0x11d   :  { %v228_v40 = vpop.permute.xlu0 %227  ;;  %677 = vmatpush.xpose.msk.msra.mxu1 %vm109_vm0, %v234_v38 }
 0x121   :  { %678 = vmatpush.xpose.msk.msra.mxu1 %vm109_vm0, %v232_v41  ;;  %v344_v41 = vld [vmem:[#allocation7] sm:$0xff] }
 0x125   :  { %v202_v43 = vpop.permute.xlu0 %201  ;;  %679 = vmatpush.xpose.msk.msra.mxu1 %vm109_vm0, %v230_v42 }
 0x126   :  { %v218_v45 = vmul.f32 %v202_v43, %v1014_v24 }
 0x129   :  { %680 = vmatpush.xpose.msk.msra.mxu1 %vm109_vm0, %v228_v40 }
 0x12c   :  { %681 = vmatmul.msk.f32.vlgmr.msra.gmra.mxu1 %vm109_vm0, %v1011_v19 }
 0x12d   :  { %v200_v44 = vpop.permute.xlu0 %199 }
 0x12e   :  { %v217_v46 = vmul.f32 %v200_v44, %v1011_v19 }
 0x130   :  { %v703_v47 = vpack.i.bf16 %v217_v46, %v218_v45  ;;  %v345_v46 = vld [vmem:[#allocation7 + $0x8] sm:$0xff] }
 0x132   :  { %704 = vrot.lane.b32.xlu0 %v703_v47, %s858_s13 }
 0x134   :  { %682 = vmatmul.msk.f32.gmra.mxu1 %vm109_vm0, %v1014_v24 }
 0x135   :  { %v198_v48 = vpop.permute.xlu0 %197 }
 0x136   :  { %v216_v50 = vmul.f32 %v198_v48, %v1014_v24 }
 0x13d   :  { %v196_v49 = vpop.permute.xlu0 %195 }
 0x13e   :  { %v215_v51 = vmul.f32 %v196_v49, %v1011_v19 }
 0x140   :  { %v708_v52 = vpack.i.bf16 %v215_v51, %v216_v50  ;;  %v724_v51 = vld [vmem:[%s1194_s4] ss:$0 sm:$0xff] }
 0x142   :  { %709 = vrot.lane.b32.xlu0 %v708_v52, %s858_s13 }
 0x145   :  { %v194_v53 = vpop.permute.xlu0 %193 }
 0x146   :  { %v214_v22 = vmul.f32 %v194_v53, %v1014_v24 }
 0x14d   :  { %v188_v54 = vpop.permute.xlu0 %187 }
 0x14e   :  { %v211_v28 = vmul.f32 %v188_v54, %v1011_v19 }
 0x1a4   :  { %v705_v55 = vpop.permute.xlu0 %704 }
 0x1a5   :  { %v706_v56 = vunpack.i.l.bf16 %v705_v55  ;;  %v707_v57 = vunpack.i.h.bf16 %v705_v55 }
 0x1a7   :  { %394 = vmatpush.msra.mxu3 %v706_v56 }
 0x1a9   :  { %395 = vmatpush.msra.mxu3 %v707_v57  ;;  %v282_v58 = vpop.f32.mrf.mxu1 }
 0x1aa   :  { %v288_v59 = vmul.f32 0.35355338, %v282_v58 }
 0x1ac   :  { %v291_v60 = vsel %vm290_vm1, %v288_v59, -inf }
 0x1ad   :  { %292 = vmax.xlane.f32.xlu1 %v291_v60  ;;  %v859_v60 = vmov 32.0  }
 0x1b1   :  { %v285_v63 = vpop.f32.mrf.mxu1 }
 0x1b2   :  { %v289_v0 = vmul.f32 0.35355338, %v285_v63 }
 0x1b4   :  { %v710_v1 = vpop.permute.xlu0 %709  ;;  %v294_v2 = vsel %vm290_vm1, %v289_v0, -inf }
 0x1b5   :  { %295 = vmax.xlane.f32.xlu2 %v294_v2  ;;  %v711_v3 = vunpack.i.l.bf16 %v710_v1  ;;  %v712_v4 = vunpack.i.h.bf16 %v710_v1 }
 0x1b7   :  { %396 = vmatpush.msra.mxu3 %v711_v3 }
 0x1b9   :  { %397 = vmatpush.msra.mxu3 %v712_v4 }
 0x1c6   :  { %189 = vrot.lane.b32.xlu1 %v1008_v13, %s858_s13 }
 0x1cd   :  { %191 = vrot.lane.b32.xlu2 %v995_v10, %s858_s13  ;;  %v304_v10 = vld [vmem:[%s1204_s14 + $0x8] sm:$0xff] }
 0x1ce   :  { %331 = vmatpush.msra.mxu2 %v304_v10 }
 0x1d0   :  { %332 = vmatpush.msra.mxu2 %v303_v12 }
 0x220   :  { %v293_v13 = vpop.xlane.xlu1 %292 }
 0x221   :  { %v297_v14 = vsub.f32 %v288_v59, %v293_v13  ;;  %v514_v13 = vld [vmem:[%s1197_s7 + $0x18] sm:$0xff] }
 0x222   :  { %537 = vmatpush.msrb.mxu2 %v514_v13 }
 0x223   :  { %v299_v15 = vmul.f32 1.442695, %v297_v14  ;;  %v513_v14 = vld [vmem:[%s1197_s7 + $0x10] sm:$0xff] }
 0x224   :  { %538 = vmatpush.msrb.mxu2 %v513_v14 }
 0x225   :  { %731 = vpow2.f32 %v299_v15  ;;  %v512_v15 = vld [vmem:[%s1197_s7 + $0x8] sm:$0xff] }
 0x226   :  { %539 = vmatpush.msrb.mxu2 %v512_v15 }
 0x228   :  { %v296_v16 = vpop.xlane.xlu2 %295 }
 0x229   :  { %v298_v17 = vsub.f32 %v289_v0, %v296_v16  ;;  %v511_v16 = vld [vmem:[%s1197_s7] sm:$0xff] }
 0x22a   :  { %540 = vmatpush.msrb.mxu2 %v511_v16 }
 0x22b   :  { %v732_v18 = vpop.eup %731  ;;  %v301_v20 = vmul.f32 1.442695, %v298_v17 }
 0x22c   :  { %683 = vmatmul.msk.f32.vlgmr.msra.gmra.mxu2 %vm290_vm1, %v732_v18 }
 0x22d   :  { %733 = vpow2.f32 %v301_v20 }
 0x230   :  { %v192_v21 = vpop.permute.xlu2 %191 }
 0x231   :  { %v213_v23 = vmul.f32 %v192_v21, %v1011_v19  ;;  %v410_v19 = vld [vmem:[%s1193_s3 + $0x8] sm:$0xff]  ;;  %v557_v21 = vld [vmem:[%s1199_s9 + $0x38] sm:$0xff] }
 0x232   :  { %437 = vmatpush.msrb.mxu0 %v410_v19 }
 0x233   :  { %v734_v25 = vpop.eup %733  ;;  %v713_v26 = vpack.i.bf16 %v213_v23, %v214_v22  ;;  %v556_v22 = vld [vmem:[%s1199_s9 + $0x30] sm:$0xff]  ;;  %v555_v23 = vld [vmem:[%s1199_s9 + $0x28] sm:$0xff] }
 0x234   :  { %684 = vmatmul.msk.f32.gmra.mxu2 %vm290_vm1, %v734_v25 }
 0x235   :  { %714 = vrot.lane.b32.xlu2 %v713_v26, %s858_s13 }
 0x238   :  { %v190_v27 = vpop.permute.xlu1 %189 }
 0x239   :  { %v212_v29 = vmul.f32 %v190_v27, %v1014_v24  ;;  %v409_v24 = vld [vmem:[%s1193_s3] sm:$0xff] }
 0x23a   :  { %438 = vmatpush.msrb.mxu0 %v409_v24  ;;  %v554_v27 = vld [vmem:[%s1199_s9 + $0x20] sm:$0xff] }
 0x23b   :  { %v718_v30 = vpack.i.bf16 %v211_v28, %v212_v29 }
 0x23d   :  { %719 = vrot.lane.b32.xlu1 %v718_v30, %s858_s13  ;;  %v553_v30 = vld [vmem:[%s1199_s9 + $0x18] sm:$0xff] }
 0x28f   :  { %v715_v31 = vpop.permute.xlu2 %714 }
 0x290   :  { %v716_v32 = vunpack.i.l.bf16 %v715_v31  ;;  %v717_v33 = vunpack.i.h.bf16 %v715_v31 }
 0x292   :  { %398 = vmatpush.msra.mxu3 %v716_v32  ;;  %v552_v32 = vld [vmem:[%s1199_s9 + $0x10] sm:$0xff] }
 0x294   :  { %399 = vmatpush.msra.mxu3 %v717_v33 }
 0x2af   :  { %v334_v36 = vpop.f32.mrf.mxu2  ;;  %v720_v37 = vpop.permute.xlu1 %719 }
 0x2b0   :  { %735 = vrcp.f32 %v334_v36  ;;  %v721_v38 = vunpack.i.l.bf16 %v720_v37  ;;  %v722_v39 = vunpack.i.h.bf16 %v720_v37  ;;  %v725_v37 = vld [vmem:[%s1195_s5] ss:$0 sm:$0xff] }
 0x2b2   :  { %400 = vmatpush.msra.mxu3 %v721_v38 }
 0x2b4   :  { %401 = vmatpush.msra.mxu3 %v722_v39 }
 0x2b6   :  { %v736_v40 = vpop.eup %735  ;;  %576 = vmatpush.msrb.mxu3 %v557_v21 }
 0x2b7   :  { %v337_v42 = vpop.f32.mrf.mxu2  ;;  %v342_v43 = vmul.f32 %v736_v40, %v732_v18 }
 0x2b8   :  { %737 = vrcp.f32 %v337_v42  ;;  %577 = vmatpush.msrb.mxu3 %v556_v22 }
 0x2b9   :  { %v346_v44 = vmul.f32 %v344_v41, %v342_v43  ;;  %739 = vrcp.f32 %v859_v60  ;;  %v726_v41 = vld [vmem:[%s1196_s6] ss:$0 sm:$0xff] }
 0x2ba   :  { %578 = vmatpush.msrb.mxu3 %v555_v23  ;;  %v728_v60 = vld [vmem:[%s1200_s10] ss:$0 sm:$0xff] }
 0x2bb   :  { %685 = vmatmul.msk.f32.vlgmr.msra.gmra.mxu3 %vm290_vm1, %v346_v44 }
 0x2bc   :  { %579 = vmatpush.msrb.mxu3 %v554_v27 }
 0x2be   :  { %v738_v45 = vpop.eup %737  ;;  %580 = vmatpush.msrb.mxu3 %v553_v30 }
 0x2bf   :  { %v343_v47 = vmul.f32 %v738_v45, %v734_v25  ;;  %v740_v61 = vpop.eup %739 }
 0x2c0   :  { %v457_v62 = vmul.f32 32.0, %v740_v61  ;;  %vm461_vm2 = vweird.f32 %v740_v61  ;;  %581 = vmatpush.msrb.mxu3 %v552_v32  ;;  %v729_v32 = vld [vmem:[%s1201_s11] ss:$0 sm:$0xff]  ;;  %s860_s11 = smov [#allocation8]  }
 0x2c1   :  { %v347_v48 = vmul.f32 %v345_v46, %v343_v47  ;;  %s655_s14 = sshll.u32 %s860_s11, 4  ;;  %s656_s14 = int_to_ptr.vmem [resolvable:$true] %s655_s14 }
 0x2c2   :  { %v458_v63 = vsub.f32 1.0, %v457_v62 }
 0x2c3   :  { %686 = vmatmul.msk.f32.gmra.mxu3 %vm290_vm1, %v347_v48 }
 0x2c4   :  { %v459_v0 = vmul.f32 %v740_v61, %v458_v63 }
 0x2c6   :  { %v460_v1 = vadd.f32 %v740_v61, %v459_v0 }
 0x2c8   :  { %v1108_v2 = vsel %vm461_vm2, %v740_v61, %v460_v1 }
 0x33e   :  { %v403_v49 = vpop.f32.mrf.mxu3 }
 0x33f   :  { %687 = vmatmul.msk.f32.vlgmr.msrb.gmra.mxu0 %vm109_vm0, %v403_v49 }
 0x346   :  { %v406_v50 = vpop.f32.mrf.mxu3 }
 0x347   :  { %688 = vmatmul.msk.f32.gmra.mxu0 %vm109_vm0, %v406_v50 }
 0x3bc   :  { %v440_v52 = vpop.f32.mrf.mxu0 }
 0x3bd   :  { %v441_v53 = vadd.f32 %v724_v51, %v440_v52  ;;  %v550_v52 = vld [vmem:[%s1199_s9] sm:$0xff] }
 0x3bf   :  { %v446_v54 = vadd.f32 %v441_v53, %v979_v6  ;;  %v727_v53 = vld [vmem:[%s1198_s8] ss:$0 sm:$0xff] }
 0x3c1   :  { %v450_v55 = vsel %vm109_vm0, %v446_v54, 0.0 }
 0x3c2   :  { %451 = vadd.xlane.f32.xlu0 %v450_v55 }
 0x3c4   :  { %v443_v56 = vpop.f32.mrf.mxu0 }
 0x3c5   :  { %v444_v57 = vadd.f32 %v724_v51, %v443_v56  ;;  %v551_v51 = vld [vmem:[%s1199_s9 + $0x8] sm:$0xff] }
 0x3c6   :  { %582 = vmatpush.msrb.mxu3 %v551_v51 }
 0x3c7   :  { %v447_v58 = vadd.f32 %v444_v57, %v997_v11 }
 0x3c8   :  { %583 = vmatpush.msrb.mxu3 %v550_v52 }
 0x3c9   :  { %v453_v59 = vsel %vm109_vm0, %v447_v58, 0.0 }
 0x3ca   :  { %454 = vadd.xlane.f32.xlu2 %v453_v59 }
 0x435   :  { %v452_v6 = vpop.xlane.xlu0 %451 }
 0x436   :  { %v463_v3 = vmul.f32 %v1108_v2, %v452_v6 }
 0x438   :  { %v465_v4 = vsub.f32 %v446_v54, %v463_v3 }
 0x43a   :  { %v467_v5 = vmul.f32 %v465_v4, %v465_v4 }
 0x43c   :  { %v469_v11 = vsel %vm109_vm0, %v467_v5, 0.0 }
 0x43d   :  { %470 = vadd.xlane.f32.xlu1 %v469_v11  ;;  %v455_v7 = vpop.xlane.xlu2 %454 }
 0x43e   :  { %v464_v8 = vmul.f32 %v1108_v2, %v455_v7 }
 0x440   :  { %v466_v9 = vsub.f32 %v447_v58, %v464_v8 }
 0x442   :  { %v468_v10 = vmul.f32 %v466_v9, %v466_v9 }
 0x444   :  { %v472_v12 = vsel %vm109_vm0, %v468_v10, 0.0 }
 0x445   :  { %473 = vadd.xlane.f32.xlu0 %v472_v12 }
 0x4b0   :  { %v471_v17 = vpop.xlane.xlu1 %470 }
 0x4b1   :  { %v475_v18 = vmul.f32 %v471_v17, %v1108_v2 }
 0x4b3   :  { %v477_v20 = vadd.f32 1e-05, %v475_v18 }
 0x4b5   :  { %741 = vrsqrt.f32 %v477_v20  ;;  %vm485_vm4 = vweird.f32 %v477_v20 }
 0x4b8   :  { %v474_v25 = vpop.xlane.xlu0 %473 }
 0x4b9   :  { %v476_v26 = vmul.f32 %v474_v25, %v1108_v2 }
 0x4bb   :  { %v742_v28 = vpop.eup %741  ;;  %v478_v29 = vadd.f32 1e-05, %v476_v26 }
 0x4bc   :  { %v480_v31 = vmul.f32 %v742_v28, %v477_v20  ;;  %vm486_vm3 = vweird.f32 %v742_v28 }
 0x4bd   :  { %743 = vrsqrt.f32 %v478_v29  ;;  %vm487_vm5 = vmor %vm485_vm4, %vm486_vm3  ;;  %vm495_vm7 = vweird.f32 %v478_v29 }
 0x4be   :  { %v481_v33 = vmul.f32 %v742_v28, %v480_v31 }
 0x4c0   :  { %v482_v34 = vmul.f32 0.5, %v481_v33 }
 0x4c2   :  { %v483_v35 = vsub.f32 1.5, %v482_v34 }
 0x4c3   :  { %v744_v19 = vpop.eup %743 }
 0x4c4   :  { %v484_v24 = vmul.f32 %v742_v28, %v483_v35  ;;  %v490_v36 = vmul.f32 %v744_v19, %v478_v29  ;;  %vm496_vm6 = vweird.f32 %v744_v19  ;;  %v730_v35 = vld [vmem:[%s1202_s12] ss:$0 sm:$0xff] }
 0x4c5   :  { %vm497_vm8 = vmor %vm495_vm7, %vm496_vm6 }
 0x4c6   :  { %v488_v38 = vsel %vm487_vm5, %v742_v28, %v484_v24  ;;  %v491_v39 = vmul.f32 %v744_v19, %v490_v36 }
 0x4c7   :  { %v499_v40 = vmul.f32 %v488_v38, %v465_v4 }
 0x4c8   :  { %v492_v42 = vmul.f32 0.5, %v491_v39 }
 0x4c9   :  { %v504_v43 = vmul.f32 %v725_v37, %v499_v40 }
 0x4ca   :  { %v493_v44 = vsub.f32 1.5, %v492_v42 }
 0x4cb   :  { %v509_v45 = vadd.f32 %v726_v41, %v504_v43 }
 0x4cc   :  { %v494_v46 = vmul.f32 %v744_v19, %v493_v44 }
 0x4cd   :  { %689 = vmatmul.msk.f32.vlgmr.msrb.gmra.mxu2 %vm109_vm0, %v509_v45 }
 0x4ce   :  { %v498_v47 = vsel %vm497_vm8, %v744_v19, %v494_v46 }
 0x4cf   :  { %v500_v48 = vmul.f32 %v498_v47, %v466_v9 }
 0x4d1   :  { %v505_v49 = vmul.f32 %v725_v37, %v500_v48 }
 0x4d3   :  { %v510_v50 = vadd.f32 %v726_v41, %v505_v49 }
 0x4d5   :  { %690 = vmatmul.msk.f32.gmra.mxu2 %vm109_vm0, %v510_v50 }
 0x550   :  { %v542_v54 = vpop.f32.mrf.mxu2 }
 0x551   :  { %v543_v55 = vadd.f32 %v727_v53, %v542_v54 }
 0x553   :  { %v548_v56 = vmax.f32 %v543_v55, 0.0 }
 0x555   :  { %691 = vmatmul.msk.f32.vlgmr.msrb.gmra.mxu3 %vm290_vm1, %v548_v56 }
 0x558   :  { %v545_v57 = vpop.f32.mrf.mxu2 }
 0x559   :  { %v546_v58 = vadd.f32 %v727_v53, %v545_v57 }
 0x55b   :  { %v549_v59 = vmax.f32 %v546_v58, 0.0 }
 0x55d   :  { %692 = vmatmul.msk.f32.gmra.mxu3 %vm290_vm1, %v549_v59 }
 0x5d8   :  { %v585_v61 = vpop.f32.mrf.mxu3 }
 0x5d9   :  { %v586_v62 = vadd.f32 %v728_v60, %v585_v61 }
 0x5db   :  { %v591_v63 = vadd.f32 %v586_v62, %v509_v45 }
 0x5dd   :  { %v595_v0 = vsel %vm109_vm0, %v591_v63, 0.0 }
 0x5de   :  { %596 = vadd.xlane.f32.xlu2 %v595_v0 }
 0x5e0   :  { %v588_v1 = vpop.f32.mrf.mxu3 }
 0x5e1   :  { %v589_v6 = vadd.f32 %v728_v60, %v588_v1 }
 0x5e3   :  { %v592_v3 = vadd.f32 %v589_v6, %v510_v50 }
 0x5e5   :  { %v598_v4 = vsel %vm109_vm0, %v592_v3, 0.0 }
 0x5e6   :  { %599 = vadd.xlane.f32.xlu1 %v598_v4 }
 0x651   :  { %v597_v5 = vpop.xlane.xlu2 %596 }
 0x652   :  { %v601_v11 = vmul.f32 %v597_v5, %v1108_v2 }
 0x654   :  { %v603_v7 = vsub.f32 %v591_v63, %v601_v11 }
 0x656   :  { %v605_v8 = vmul.f32 %v603_v7, %v603_v7 }
 0x658   :  { %v607_v9 = vsel %vm109_vm0, %v605_v8, 0.0 }
 0x659   :  { %v600_v10 = vpop.xlane.xlu1 %599  ;;  %608 = vadd.xlane.f32.xlu0 %v607_v9 }
 0x65a   :  { %v602_v12 = vmul.f32 %v600_v10, %v1108_v2 }
 0x65c   :  { %v604_v13 = vsub.f32 %v592_v3, %v602_v12 }
 0x65e   :  { %v606_v14 = vmul.f32 %v604_v13, %v604_v13 }
 0x660   :  { %v610_v15 = vsel %vm109_vm0, %v606_v14, 0.0 }
 0x661   :  { %611 = vadd.xlane.f32.xlu2 %v610_v15 }
 0x6cc   :  { %v609_v16 = vpop.xlane.xlu0 %608 }
 0x6cd   :  { %v613_v17 = vmul.f32 %v609_v16, %v1108_v2 }
 0x6cf   :  { %v615_v18 = vadd.f32 1e-05, %v613_v17 }
 0x6d1   :  { %745 = vrsqrt.f32 %v615_v18  ;;  %vm623_vm10 = vweird.f32 %v615_v18 }
 0x6d4   :  { %v612_v20 = vpop.xlane.xlu2 %611 }
 0x6d5   :  { %v614_v21 = vmul.f32 %v612_v20, %v1108_v2 }
 0x6d7   :  { %v746_v22 = vpop.eup %745  ;;  %v616_v23 = vadd.f32 1e-05, %v614_v21 }
 0x6d8   :  { %v618_v25 = vmul.f32 %v746_v22, %v615_v18  ;;  %vm624_vm9 = vweird.f32 %v746_v22 }
 0x6d9   :  { %747 = vrsqrt.f32 %v616_v23  ;;  %vm625_vm11 = vmor %vm623_vm10, %vm624_vm9  ;;  %vm633_vm13 = vweird.f32 %v616_v23 }
 0x6da   :  { %v619_v26 = vmul.f32 %v746_v22, %v618_v25 }
 0x6dc   :  { %v620_v27 = vmul.f32 0.5, %v619_v26 }
 0x6de   :  { %v621_v28 = vsub.f32 1.5, %v620_v27 }
 0x6df   :  { %v748_v29 = vpop.eup %747 }
 0x6e0   :  { %v622_v30 = vmul.f32 %v746_v22, %v621_v28  ;;  %v628_v31 = vmul.f32 %v748_v29, %v616_v23  ;;  %vm634_vm12 = vweird.f32 %v748_v29 }
 0x6e1   :  { %vm635_vm14 = vmor %vm633_vm13, %vm634_vm12 }
 0x6e2   :  { %v626_v33 = vsel %vm625_vm11, %v746_v22, %v622_v30  ;;  %v629_v34 = vmul.f32 %v748_v29, %v628_v31 }
 0x6e3   :  { %v637_v2 = vmul.f32 %v626_v33, %v603_v7 }
 0x6e4   :  { %v630_v19 = vmul.f32 0.5, %v629_v34 }
 0x6e5   :  { %v642_v24 = vmul.f32 %v729_v32, %v637_v2 }
 0x6e6   :  { %v631_v36 = vsub.f32 1.5, %v630_v19 }
 0x6e7   :  { %v647_v37 = vadd.f32 %v730_v35, %v642_v24 }
 0x6e8   :  { %v632_v38 = vmul.f32 %v748_v29, %v631_v36 }
 0x6e9   :  { %649 = vst.msk [vmem:[#allocation8] sm:$0xff] %vm109_vm0, %v647_v37 }
 0x6ea   :  { %v636_v39 = vsel %vm635_vm14, %v748_v29, %v632_v38 }
 0x6eb   :  { %v638_v40 = vmul.f32 %v636_v39, %v604_v13 }
 0x6ed   :  { %v643_v41 = vmul.f32 %v729_v32, %v638_v40 }
 0x6ef   :  { %v648_v42 = vadd.f32 %v730_v35, %v643_v41 }
 0x6f1   :  { %650 = vst.msk [vmem:[#allocation8 + $0x8] sm:$0xff] %vm109_vm0, %v648_v42 }
 0x6f2   :  { %663 = dma.vmem_to_hbm [thread:$0]  %s656_s14, 256, %s658_s20, [#allocation4], %s853_s17, %s853_s17, %s854_s18  }
 0x6f3   :  { %849 = dma.done.wait [#allocation4], 256  }
 0x6f4   :  { %850 = vsyncadd [#allocation4], 4294967040 }
 0x6f5   :  { %668 = vsyncpa [#allocation3], 1 }
 0x6f6   :  { %669 = vsyncpa [#allocation6], 1 }
 0x6f7   :  { %670 = vsyncpa [#allocation4], 1 }

</bundles_post_ra>
